<compile_context>
chip_gen: v7x
topology: tpu7x:2x2x1
jax: 0.10.0
libtpu: 0.0.40
codegen_flags: <defaults>
</compile_context>

<pallas_src>
import functools

import jax
import jax.numpy as jnp
from jax.experimental import pallas as pl
from jax.experimental.pallas import tpu as pltpu


def _mlp_kernel(p_ref, x_ref, o_ref, *, layers, in_dtype):
    """Fused 4-layer MLP on one (n_x, row_tile) tile of X^T.

    p_ref : packed parameters, shape (rows, 128).  For each layer `l`,
            rows [r, r+out_d) hold [W_l | b_l] in columns [0, in_d+1).
    x_ref : (n_x, row_tile) tile of X^T  (batch on lanes).
    o_ref : (n_y, row_tile) lane-dense output tile of Y^T.
    """
    p = p_ref[...]
    h = x_ref[...]                       # (n_x, row_tile), batch on lanes
    n_layers = len(layers)
    for li, (r, out_d, in_d, apply_relu) in enumerate(layers):
        w = p[r:r + out_d, :in_d]                         # (out_d, in_d)
        b = p[r:r + out_d, in_d:in_d + 1].astype(jnp.float32)  # (out_d, 1)
        h = jnp.dot(w, h, preferred_element_type=jnp.float32) + b
        if apply_relu:
            h = jnp.maximum(h, 0.0)
        if li < n_layers - 1:
            h = h.astype(in_dtype)       # feed narrow dtype back to the MXU
    o_ref[...] = h.astype(o_ref.dtype)


def pack_params(params, dtype):
    """Pack all layer weights/biases into one lane-dense (rows, 128) array.

    params: list of (w, b) with w shape (out_features, in_features) and
            b shape (out_features,)  (PyTorch nn.Linear convention).
    Returns (packed_array, layer_meta) where layer_meta is a static tuple of
    (row_offset, out_d, in_d, apply_relu) per layer.
    """
    blocks = []
    meta = []
    row = 0
    n_layers = len(params)
    for idx, (w, b) in enumerate(params):
        out_d, in_d = w.shape
        assert in_d + 1 <= 128, "layer fan_in must fit in one 128-lane vreg row"
        blk = jnp.zeros((out_d, 128), dtype)
        blk = blk.at[:, :in_d].set(w.astype(dtype))
        blk = blk.at[:, in_d].set(b.astype(dtype))
        out_pad = -(-out_d // 8) * 8                      # 8-align row blocks
        blk = jnp.pad(blk, ((0, out_pad - out_d), (0, 0)))
        blocks.append(blk)
        meta.append((row, out_d, in_d, idx < n_layers - 1))  # ReLU on first 3
        row += out_pad
    packed = jnp.concatenate(blocks, axis=0)
    return packed, tuple(meta)


def synthetic3layer_forward(X, params, *, row_tile=512):
    """Fused batched MLP.  X: (n_obs, n_x) -> Y: (n_obs, n_y)."""
    n_obs, n_x = X.shape
    n_y = params[-1][0].shape[0]
    compute_dtype = X.dtype

    packed, layer_meta = pack_params(params, compute_dtype)

    # Lane-dense tiling over the (padded) batch axis.
    row_tile = max(128, (int(row_tile) // 128) * 128)
    n_pad = pl.cdiv(n_obs, 128) * 128
    row_tile = min(row_tile, n_pad)
    n_pad = pl.cdiv(n_pad, row_tile) * row_tile
    grid = (n_pad // row_tile,)

    # X^T with the batch axis zero-padded to n_pad (padding sliced off below).
    xt = jnp.zeros((n_x, n_pad), compute_dtype)
    xt = xt.at[:, :n_obs].set(X.T.astype(compute_dtype))

    kernel = functools.partial(_mlp_kernel, layers=layer_meta,
                               in_dtype=compute_dtype)

    yt = pl.pallas_call(
        kernel,
        out_shape=jax.ShapeDtypeStruct((n_y, n_pad), X.dtype),
        grid_spec=pltpu.PrefetchScalarGridSpec(
            num_scalar_prefetch=0,
            grid=grid,
            in_specs=[
                # packed params: grid-invariant, fetched once.
                pl.BlockSpec(packed.shape, lambda i: (0, 0)),
                # X^T tiled over the lane (batch) axis.
                pl.BlockSpec((n_x, row_tile), lambda i: (0, i)),
            ],
            out_specs=pl.BlockSpec((n_y, row_tile), lambda i: (0, i)),
        ),
        compiler_params=pltpu.CompilerParams(
            dimension_semantics=("parallel",)),
    )(packed, xt)

    return yt[:, :n_obs].T


def init_params(key, n_x, n_y):
    """PyTorch-default-like Linear init, stored in nn.Linear convention:
    weight (out_features, in_features), bias (out_features,)."""
    h1 = int(0.5 * (n_x + n_y))
    h2 = int(0.6 * (n_x + n_y))
    dims = [(n_x, h1), (h1, h2), (h2, n_y), (n_y, n_y)]
    params = []
    for fan_in, fan_out in dims:
        key, kw, kb = jax.random.split(key, 3)
        bound = 1.0 / (fan_in ** 0.5)
        w = jax.random.uniform(kw, (fan_out, fan_in), jnp.float32, -bound, bound)
        b = jax.random.uniform(kb, (fan_out,), jnp.float32, -bound, bound)
        params.append((w, b))
    return params


def reference_forward(X, params):
    """Plain-JAX reference matching the PyTorch forward semantics."""
    h = X
    for idx, (w, b) in enumerate(params):
        h = h @ w.T + b
        if idx < len(params) - 1:        # ReLU after the first three Linears
            h = jnp.maximum(h, 0.0)
    return h


if __name__ == "__main__":
    # Small shapes consistent with the module: X is (n_obs, n_x).
    # n_obs deliberately NOT a multiple of the tile to exercise padding.
    n_obs, n_x, n_y = 50, 16, 8

    key = jax.random.PRNGKey(0)
    key, kx = jax.random.split(key)
    X = jax.random.normal(kx, (n_obs, n_x), jnp.float32)

    params = init_params(key, n_x, n_y)

    Y = synthetic3layer_forward(X, params)
    Y = jax.block_until_ready(Y)

    Y_ref = reference_forward(X, params)
    assert Y.shape == (n_obs, n_y)
    assert jnp.allclose(Y, Y_ref, atol=1e-5, rtol=1e-5), "mismatch vs reference"

    print("KERNEL_OK")
</pallas_src>

<mosaic_0001>
module attributes {stable_mosaic.version = 11 : i64} {
  func.func @_mlp_kernel(%arg0: i32, %arg1: memref<48x128xf32, #tpu.memory_space<vmem>>, %arg2: memref<16x128xf32, #tpu.memory_space<vmem>>, %arg3: memref<8x128xf32, #tpu.memory_space<vmem>>) attributes {dimension_semantics = [#tpu.dimension_semantics<parallel>], iteration_bounds = array<i64: 1>, scalar_prefetch = 0 : i64, scratch_operands = 0 : i64, tpu.core_type = #tpu.core_type<tc>, window_params = [{pipeline_mode = #tpu.pipeline_mode<synchronous>, transform_indices = @transform_0, window_bounds = array<i64: 48, 128>}, {transform_indices = @transform_1, window_bounds = array<i64: 16, 128>}, {transform_indices = @transform_2, window_bounds = array<i64: 8, 128>}]} {
    %c0 = arith.constant 0 : index
    %c0_0 = arith.constant 0 : index
    %0 = vector.load %arg1[%c0, %c0_0] : memref<48x128xf32, #tpu.memory_space<vmem>>, vector<48x128xf32>
    %c0_1 = arith.constant 0 : index
    %c0_2 = arith.constant 0 : index
    %1 = vector.load %arg2[%c0_1, %c0_2] : memref<16x128xf32, #tpu.memory_space<vmem>>, vector<16x128xf32>
    %2 = vector.extract_strided_slice %0 {offsets = [0, 0], sizes = [12, 16], strides = [1, 1]} : vector<48x128xf32> to vector<12x16xf32>
    %3 = vector.extract_strided_slice %0 {offsets = [0, 16], sizes = [12, 1], strides = [1, 1]} : vector<48x128xf32> to vector<12x1xf32>
    %cst = arith.constant dense<0.000000e+00> : vector<12x128xf32>
    %4 = tpu.matmul %2, %1, %cst {dimension_numbers = #tpu.dot_dimension_numbers<[1], [0], [0], [1], [0, 0, 1, 1], [], []>} : vector<12x16xf32>, vector<16x128xf32>, vector<12x128xf32> -> vector<12x128xf32>
    %5 = vector.broadcast %3 : vector<12x1xf32> to vector<12x128xf32>
    %6 = arith.addf %4, %5 : vector<12x128xf32>
    %cst_3 = arith.constant 0.000000e+00 : f32
    %7 = vector.broadcast %cst_3 : f32 to vector<12x128xf32>
    %8 = arith.maximumf %6, %7 : vector<12x128xf32>
    %9 = vector.extract_strided_slice %0 {offsets = [16, 0], sizes = [14, 12], strides = [1, 1]} : vector<48x128xf32> to vector<14x12xf32>
    %10 = vector.extract_strided_slice %0 {offsets = [16, 12], sizes = [14, 1], strides = [1, 1]} : vector<48x128xf32> to vector<14x1xf32>
    %cst_4 = arith.constant dense<0.000000e+00> : vector<14x128xf32>
    %11 = tpu.matmul %9, %8, %cst_4 {dimension_numbers = #tpu.dot_dimension_numbers<[1], [0], [0], [1], [0, 0, 1, 1], [], []>} : vector<14x12xf32>, vector<12x128xf32>, vector<14x128xf32> -> vector<14x128xf32>
    %12 = vector.broadcast %10 : vector<14x1xf32> to vector<14x128xf32>
    %13 = arith.addf %11, %12 : vector<14x128xf32>
    %cst_5 = arith.constant 0.000000e+00 : f32
    %14 = vector.broadcast %cst_5 : f32 to vector<14x128xf32>
    %15 = arith.maximumf %13, %14 : vector<14x128xf32>
    %16 = vector.extract_strided_slice %0 {offsets = [32, 0], sizes = [8, 14], strides = [1, 1]} : vector<48x128xf32> to vector<8x14xf32>
    %17 = vector.extract_strided_slice %0 {offsets = [32, 14], sizes = [8, 1], strides = [1, 1]} : vector<48x128xf32> to vector<8x1xf32>
    %cst_6 = arith.constant dense<0.000000e+00> : vector<8x128xf32>
    %18 = tpu.matmul %16, %15, %cst_6 {dimension_numbers = #tpu.dot_dimension_numbers<[1], [0], [0], [1], [0, 0, 1, 1], [], []>} : vector<8x14xf32>, vector<14x128xf32>, vector<8x128xf32> -> vector<8x128xf32>
    %19 = vector.broadcast %17 : vector<8x1xf32> to vector<8x128xf32>
    %20 = arith.addf %18, %19 : vector<8x128xf32>
    %cst_7 = arith.constant 0.000000e+00 : f32
    %21 = vector.broadcast %cst_7 : f32 to vector<8x128xf32>
    %22 = arith.maximumf %20, %21 : vector<8x128xf32>
    %23 = vector.extract_strided_slice %0 {offsets = [40, 0], sizes = [8, 8], strides = [1, 1]} : vector<48x128xf32> to vector<8x8xf32>
    %24 = vector.extract_strided_slice %0 {offsets = [40, 8], sizes = [8, 1], strides = [1, 1]} : vector<48x128xf32> to vector<8x1xf32>
    %cst_8 = arith.constant dense<0.000000e+00> : vector<8x128xf32>
    %25 = tpu.matmul %23, %22, %cst_8 {dimension_numbers = #tpu.dot_dimension_numbers<[1], [0], [0], [1], [0, 0, 1, 1], [], []>} : vector<8x8xf32>, vector<8x128xf32>, vector<8x128xf32> -> vector<8x128xf32>
    %26 = vector.broadcast %24 : vector<8x1xf32> to vector<8x128xf32>
    %27 = arith.addf %25, %26 : vector<8x128xf32>
    %c0_9 = arith.constant 0 : index
    %c0_10 = arith.constant 0 : index
    %28 = vector.load %arg3[%c0_9, %c0_10] : memref<8x128xf32, #tpu.memory_space<vmem>>, vector<8x128xf32>
    tpu.vector_store %arg3[%c0_9, %c0_10], %27 {strides = array<i32>} : memref<8x128xf32, #tpu.memory_space<vmem>>, vector<8x128xf32>,
    return
  }
  func.func @transform_0(%arg0: i32) -> (i32, i32) {
    %c0_i32 = arith.constant 0 : i32
    %c0_i32_0 = arith.constant 0 : i32
    %c0_i32_1 = arith.constant 0 : i32
    return %c0_i32, %c0_i32_0 : i32, i32
  }
  func.func @transform_1(%arg0: i32) -> (i32, i32) {
    %c0_i32 = arith.constant 0 : i32
    %c0_i32_0 = arith.constant 0 : i32
    return %c0_i32, %arg0 : i32, i32
  }
  func.func @transform_2(%arg0: i32) -> (i32, i32) {
    %c0_i32 = arith.constant 0 : i32
    %c0_i32_0 = arith.constant 0 : i32
    return %c0_i32, %arg0 : i32, i32
  }
}

</mosaic_0001>

<bundles_post_ra>
// kernel: tpu_custom_call.1
= control target key start
LH: loop header
LB: loop body
LE: loop exit
PB: predicated region body
PF: predicated region fallthrough
CT: control target
= control target key end

     0   :  { %7 = vsyncpa [#allocation3], 0  ;;  %s633_s0 = inlined_call_operand.hbm [shape: f32[48,128], index: 0, kind: input, shape index: {}]   ;;  %s634_s1 = inlined_call_operand.hbm [shape: f32[16,128], index: 1, kind: input, shape index: {}]   ;;  %s635_s2 = inlined_call_operand.hbm [shape: f32[8,128], index: 2, kind: output, shape index: {}]  }
   0x1   :  { %8 = vsyncpa [#allocation6], 0 }
   0x2   :  { %9 = vsyncpa [#allocation4], 0  ;;  %s565_s9 = smov [#allocation2]   ;;  %s493_s13 = scalar_lea.hbm %s633_s0, 768 }
   0x3   :  { %s15_s10 = sshll.u32 %s565_s9, 4  ;;  %p494_p0 = scmp.ne.s32.totalorder %s633_s0, %s493_s13  ;;  %s16_s10 = int_to_ptr.vmem [resolvable:$true] %s15_s10 }
   0x4   :  { %p497_p1 = scmp.lt.u32.totalorder %s493_s13, %s633_s0 }
   0x6   :  { %p499_p2 = pnand %p497_p1, %p494_p0 }
   0x8   :  { %502 = shalt.err (!%p499_p2)
}
   0x9   :  { %s503_s18 = scalar_lea.vmem %s16_s10, 768  ;;  %p508_p4 = scmp.lt.s32.totalorder %s16_s10, %s16_s10 }
   0xa   :  { %p504_p3 = scmp.ne.s32.totalorder %s16_s10, %s503_s18  ;;  %p509_p5 = scmp.lt.s32.totalorder %s503_s18, %s503_s18 }
   0xc   :  { %p510_p6 = por %p509_p5, %p508_p4 }
   0xe   :  { %p511_p7 = pnand %p510_p6, %p504_p3 }
  0x10   :  { %514 = shalt.err (!%p511_p7)
}
  0x11   :  { %s566_s19 = smov 128   ;;  %s567_s20 = smov 8  }
  0x12   :  { %21 = dma.hbm_to_vmem [thread:$0]  %s633_s0, 768, %s16_s10, [#allocation3], %s566_s19, %s566_s19, %s567_s20  }
  0x13   :  { %s568_s23 = smov [#allocation5]   ;;  %s515_s27 = scalar_lea.hbm %s634_s1, 256 }
  0x14   :  { %s27_s24 = sshll.u32 %s568_s23, 4  ;;  %p516_p8 = scmp.ne.s32.totalorder %s634_s1, %s515_s27  ;;  %s28_s24 = int_to_ptr.vmem [resolvable:$true] %s27_s24 }
  0x15   :  { %p519_p9 = scmp.lt.u32.totalorder %s515_s27, %s634_s1 }
  0x17   :  { %p521_p10 = pnand %p519_p9, %p516_p8 }
  0x19   :  { %524 = shalt.err (!%p521_p10)
}
  0x1a   :  { %s525_s4 = scalar_lea.vmem %s28_s24, 256  ;;  %p530_p12 = scmp.lt.s32.totalorder %s28_s24, %s28_s24 }
  0x1b   :  { %p526_p11 = scmp.ne.s32.totalorder %s28_s24, %s525_s4  ;;  %p531_p13 = scmp.lt.s32.totalorder %s525_s4, %s525_s4 }
  0x1d   :  { %p532_p0 = por %p531_p13, %p530_p12 }
  0x1f   :  { %p533_p1 = pnand %p532_p0, %p526_p11 }
  0x21   :  { %536 = shalt.err (!%p533_p1)
}
  0x22   :  { %33 = dma.hbm_to_vmem [thread:$0]  %s634_s1, 256, %s28_s24, [#allocation6], %s566_s19, %s566_s19, %s567_s20  }
  0x23   :  { %559 = dma.done.wait [#allocation3], 768  }
  0x24   :  { %560 = vsyncadd [#allocation3], 4294966528 }
  0x25   :  { %561 = dma.done.wait [#allocation6], 256  }
  0x26   :  { %562 = vsyncadd [#allocation6], 4294967040  ;;  %v569_v0 = vmov 16   ;;  %vm58_vm0 = vcmask 130048   ;;  %v46_v1 = vld [vmem:[#allocation5] sm:$0xff]  ;;  %v47_v2 = vld [vmem:[#allocation5 + $0x8] sm:$0xff] }
  0x27   :  { %488 = vset.pattern.permute.xlu0 %v569_v0  ;;  %v40_v3 = vld [vmem:[#allocation2] sm:$0xff]  ;;  %v461_v4 = vpack.c.bf16 %v47_v2, %v46_v1  ;;  %v41_v5 = vld [vmem:[#allocation2 + $0x8] sm:$0xff]  ;;  %v42_v6 = vld [vmem:[#allocation2 + $0x10] sm:$0xff]  ;;  %vm150_vm1 = vcmask 97280   ;;  %v570_v7 = vmov 12   ;;  %vm155_vm2 = vcmask 1043456  }
  0x28   :  { %439 = vmatprep.mubr.msk.f32.mxu0 %vm58_vm0, %v40_v3  ;;  %50 = vperm.xlu0 %488, %v40_v3   ;;  %v43_v8 = vld [vmem:[#allocation2 + $0x18] sm:$0xff]  ;;  %vm571_vm3 = vmmov 1   ;;  %v572_v18 = vmov 0.0|0.0   ;;  %vm573_vm5 = vmmov 0   ;;  %v574_v19 = vmov 0.0   ;;  %v44_v20 = vld [vmem:[#allocation2 + $0x20] sm:$0xff] }
  0x29   :  { %462 = vmatprep.subr.bf16.mxu0 %v461_v4  ;;  %446 = vmatprep.mubr.msk.f32.mxu1 %vm150_vm1, %v42_v6  ;;  %vm466_vm4 = vmpackc.low %vm155_vm2, %vm571_vm3  ;;  %v575_v21 = vmov 14   ;;  %vm244_vm6 = vcmask 1045504   ;;  %vm241_vm8 = vcmask 113664   ;;  %v45_v31 = vld [vmem:[#allocation2 + $0x28] sm:$0xff]  ;;  %v576_v32 = vmov 8   ;;  %s577_s1 = smov [#allocation7]  }
  0x2a   :  { %464 = vmatpush3.bf16.msra.mxu0 %v461_v4  ;;  %489 = vset.pattern.permute.xlu1 %v570_v7  ;;  %vm473_vm7 = vmpackc.low %vm244_vm6, %vm571_vm3  ;;  %vm324_vm9 = vcmask 64512   ;;  %s404_s6 = sshll.u32 %s577_s1, 4  ;;  %s405_s6 = int_to_ptr.vmem [resolvable:$true] %s404_s6 }
  0x2b   :  { %142 = vperm.xlu1 %489, %v42_v6   ;;  %471 = vmatprep.subr.bf16.mxu0 %v572_v18  ;;  %s537_s7 = scalar_lea.vmem %s405_s6, 128  ;;  %p542_p3 = scmp.lt.s32.totalorder %s405_s6, %s405_s6 }
  0x2c   :  { %55 = vperm.xlu0 %488, %v41_v5   ;;  %p538_p2 = scmp.ne.s32.totalorder %s405_s6, %s537_s7  ;;  %p543_p4 = scmp.lt.s32.totalorder %s537_s7, %s537_s7 }
  0x2d   :  { %440 = vmatmul.mubr.msk.f32.vlgmr.msra.gmra.mrb[0].mxu0 %vm58_vm0, %v41_v5 }
  0x2e   :  { %453 = vmatprep.mubr.msk.f32.mxu0 %vm573_vm5, %v574_v19  ;;  %p544_p5 = por %p543_p4, %p542_p3 }
  0x2f   :  { %147 = vperm.xlu1 %489, %v43_v8  }
  0x30   :  { %490 = vset.pattern.permute.xlu0 %v575_v21  ;;  %p545_p6 = pnand %p544_p5, %p538_p2 }
  0x31   :  { %238 = vperm.xlu0 %490, %v44_v20  }
  0x33   :  { %491 = vset.pattern.permute.xlu1 %v576_v32 }
  0x34   :  { %321 = vperm.xlu1 %491, %v45_v31  }
  0x35   :  { %492 = vset.pattern.permute.xlu0 %v576_v32 }
  0xa7   :  { %v51_v9 = vpop.permute.xlu0 %50 }
  0xaa   :  { %v143_v22 = vpop.permute.xlu1 %142 }
  0xab   :  { %v56_v10 = vpop.permute.xlu0 %55 }
  0xae   :  { %v148_v23 = vpop.permute.xlu1 %147 }
  0xb0   :  { %v239_v33 = vpop.permute.xlu0 %238 }
  0xb3   :  { %v322_v38 = vpop.permute.xlu1 %321 }
 0x100   :  { %v441_v11 = vpop.f32.mrb[0].mxu0 }
 0x101   :  { %v135_v12 = vadd.f32 %v441_v11, %v56_v10  ;;  %v129_v13 = vpop.f32.mrb[1].mxu0 }
 0x102   :  { %v130_v14 = vadd.f32 %v129_v13, %v51_v9 }
 0x103   :  { %v139_v15 = vmax.f32 %v135_v12, 0.0 }
 0x104   :  { %v138_v16 = vmax.f32 %v130_v14, 0.0 }
 0x106   :  { %v465_v17 = vpack.c.bf16 %v139_v15, %v138_v16 }
 0x108   :  { %467 = vmatprep.subr.msk.bf16.mxu1 %vm466_vm4, %v465_v17 }
 0x109   :  { %470 = vmatpush3.bf16.msk.msra.mxu1 %vm466_vm4, %v465_v17 }
 0x10a   :  { %456 = vmatprep.subr.mxu1 %v574_v19 }
 0x10c   :  { %447 = vmatmul.mubr.msk.f32.vlgmr.msra.gmra.mrb[0].mxu1 %vm150_vm1, %v43_v8 }
 0x10d   :  { %458 = vmatprep.mubr.msk.f32.mxu1 %vm573_vm5, %v574_v19 }
 0x1df   :  { %v448_v24 = vpop.f32.mrb[0].mxu1 }
 0x1e0   :  { %v231_v25 = vadd.f32 %v448_v24, %v148_v23  ;;  %v225_v26 = vpop.f32.mrb[1].mxu1 }
 0x1e1   :  { %v226_v27 = vadd.f32 %v225_v26, %v143_v22 }
 0x1e2   :  { %v235_v28 = vmax.f32 %v231_v25, 0.0 }
 0x1e3   :  { %v234_v29 = vmax.f32 %v226_v27, 0.0 }
 0x1e5   :  { %v472_v30 = vpack.c.bf16 %v235_v28, %v234_v29 }
 0x1e7   :  { %474 = vmatpush3.bf16.msk.msra.mxu0 %vm473_vm7, %v472_v30 }
 0x1ea   :  { %454 = vmatmul.mubr.msk.f32.vlgmr.msra.gmra.mrb[2].mxu0 %vm241_vm8, %v44_v20 }
 0x2bd   :  { %v314_v34 = vpop.f32.mrb[2].mxu0 }
 0x2be   :  { %v315_v35 = vadd.f32 %v314_v34, %v239_v33  ;;  %v455_v36 = vpop.f32.mrb[3].mxu0 }
 0x2c0   :  { %v318_v37 = vmax.f32 %v315_v35, 0.0 }
 0x2c2   :  { %457 = vmatpush3.msra.mxu1 %v318_v37 }
 0x2c3   :  { %459 = vmatmul.mubr.msk.f32.vlgmr.msra.gmra.mrb[2].mxu1 %vm324_vm9, %v45_v31 }
 0x396   :  { %v393_v39 = vpop.f32.mrb[2].mxu1 }
 0x397   :  { %v394_v40 = vadd.f32 %v393_v39, %v322_v38  ;;  %v460_v41 = vpop.f32.mrb[3].mxu1 }
 0x399   :  { %397 = vst [vmem:[#allocation7] sm:$0xff] %v394_v40 }
 0x39a   :  { %548 = shalt.err (!%p545_p6)
}
 0x39b   :  { %s549_s10 = scalar_lea.hbm %s635_s2, 128 }
 0x39c   :  { %p550_p7 = scmp.ne.s32.totalorder %s635_s2, %s549_s10  ;;  %p553_p8 = scmp.lt.u32.totalorder %s549_s10, %s635_s2 }
 0x39e   :  { %p555_p9 = pnand %p553_p8, %p550_p7 }
 0x3a0   :  { %558 = shalt.err (!%p555_p9)
}
 0x3a1   :  { %407 = dma.vmem_to_hbm [thread:$0]  %s405_s6, 128, %s635_s2, [#allocation4]  }
 0x3a2   :  { %563 = dma.done.wait [#allocation4], 128  }
 0x3a3   :  { %564 = vsyncadd [#allocation4], 4294967168 }
 0x3a4   :  { %411 = vsyncpa [#allocation3], 1 }
 0x3a5   :  { %412 = vsyncpa [#allocation6], 1 }
 0x3a6   :  { %413 = vsyncpa [#allocation4], 1 }

</bundles_post_ra>
